<compile_context>
chip_gen: v7x
topology: tpu7x:2x2x1
jax: 0.10.0
libtpu: 0.0.40
codegen_flags: <defaults>
</compile_context>

<pallas_src>
import functools

import numpy as np
import jax
import jax.numpy as jnp
from jax.experimental import pallas as pl
from jax.experimental.pallas import tpu as pltpu

LANE = 128  # lane-dense width for the (small) input / output feature axes


# ----------------------------------------------------------------------------
# Fused whole-network Pallas kernel: 4 matmuls, zero scratch
# ----------------------------------------------------------------------------
def _inversion_kernel(x_ref, w1_ref, b1_ref, w2_ref, b2_ref, w3_ref, b3_ref,
                      w4_ref, b4_ref, o_ref, *, leak):
    """x_ref: (N, 128) bf16 NHWC-flattened+padded pixels; o_ref: (N, 128) f32."""
    f32 = jnp.float32
    bf16 = jnp.bfloat16

    def lrelu(v):  # f32 LeakyReLU (VPU; keeps v5e happy -- no bf16 VALU there)
        return jnp.where(v > 0, v, leak * v)

    # 1) fromRGB: equalized 1x1 conv as a block-diagonal matmul -> (N, 512)
    h1 = lrelu(jnp.dot(x_ref[...], w1_ref[...],
                       preferred_element_type=f32) + b1_ref[...])

    # 2) groupScaleZero[0]: 3x3 conv, padding=1, as ONE Toeplitz matmul (K=512)
    h2 = lrelu(jnp.dot(h1.astype(bf16), w2_ref[...],
                       preferred_element_type=f32) + b2_ref[...])

    # 3) groupScaleZero[1]: EqualizedLinear(c0*16, c0); NCHW flatten folded into
    #    the pre-permuted weight, so no in-kernel transpose / tap loop. (K=512)
    h3 = lrelu(jnp.dot(h2.astype(bf16), w3_ref[...],
                       preferred_element_type=f32) + b3_ref[...])

    # 4) decisionLayer: EqualizedLinear(c0, latent), no activation
    a4 = jnp.dot(h3.astype(bf16), w4_ref[...],
                 preferred_element_type=f32) + b4_ref[...]
    o_ref[...] = a4.astype(o_ref.dtype)


def inversion_net_forward(packed, x_nchw, *, latent, leak=0.2):
    """Full InversionNet forward (scale-0 path) in one pallas_call."""
    N, Cin, H, W = x_nchw.shape
    assert H * W == 16, "groupScaleZero[1] expects a 4x4 spatial input"
    assert latent <= LANE, "decision output is packed into 128 lanes"
    kin = H * W * Cin
    assert kin <= LANE, "NHWC-flattened input must fit in 128 lanes"
    kmid = packed["w2"].shape[0]          # hw * c0

    # Minimal per-call glue on the tiny input: NCHW -> NHWC flatten -> pad to 128
    # lanes, cast to bf16 (one fused XLA op; negligible at these sizes).
    x_rows = jnp.transpose(x_nchw, (0, 2, 3, 1)).reshape(N, kin).astype(jnp.bfloat16)
    x_p = jnp.pad(x_rows, ((0, 0), (0, LANE - kin)))

    flops = 2 * N * (LANE * kmid + kmid * kmid + kmid * LANE + LANE * LANE)
    bytes_accessed = (
        N * LANE * 2                                   # x (bf16 in)
        + sum(int(np.prod(packed[k].shape)) * packed[k].dtype.itemsize
              for k in packed)                         # weights / biases
        + N * LANE * 4)                                # output (f32)

    kernel = functools.partial(_inversion_kernel, leak=float(leak))
    out_padded = pl.pallas_call(
        kernel,
        out_shape=jax.ShapeDtypeStruct((N, LANE), jnp.float32),
        in_specs=[pl.BlockSpec(memory_space=pltpu.MemorySpace.VMEM)] * 9,
        out_specs=pl.BlockSpec(memory_space=pltpu.MemorySpace.VMEM),
        compiler_params=pltpu.CompilerParams(vmem_limit_bytes=32 * 1024 * 1024),
        cost_estimate=pl.CostEstimate(flops=flops, transcendentals=0,
                                      bytes_accessed=bytes_accessed),
    )(x_p,
      packed["w1"], packed["b1"],
      packed["w2"], packed["b2"],
      packed["w3"], packed["b3"],
      packed["w4"], packed["b4"])
    return out_padded[:, :latent]


# ----------------------------------------------------------------------------
# Parameter initialization (PyTorch layouts) + one-time packing for the kernel
# ----------------------------------------------------------------------------
def init_raw_params(key, c0=32, dim_in=3, latent=64):
    k1, k2, k3, k4 = jax.random.split(key, 4)
    return {
        # EqualizedConv2d(dim_in, c0, 1): weight (out, in, 1, 1), bias zero
        "w_rgb": jax.random.normal(k1, (c0, dim_in, 1, 1), jnp.float32),
        "b_rgb": jnp.zeros((c0,), jnp.float32),
        # EqualizedConv2d(c0, c0, 3, padding=1): weight (out, in, 3, 3)
        "w_conv": jax.random.normal(k2, (c0, c0, 3, 3), jnp.float32),
        "b_conv": jnp.zeros((c0,), jnp.float32),
        # EqualizedLinear(c0 * 16, c0): weight (out, in)
        "w_fc1": jax.random.normal(k3, (c0, c0 * 16), jnp.float32),
        "b_fc1": jnp.zeros((c0,), jnp.float32),
        # decisionLayer = EqualizedLinear(c0, latent): weight (out, in)
        "w_dec": jax.random.normal(k4, (latent, c0), jnp.float32),
        "b_dec": jnp.zeros((latent,), jnp.float32),
    }


def pack_params(raw, *, c0, cin, latent, h, w):
    """One-time packing: fold He scale (f32), fold conv-stencil / NCHW-flatten
    permutations into the weights, zero-pad, cast to bf16."""
    hw = h * w
    kmid = hw * c0
    s_rgb = float(np.sqrt(2.0 / (cin * 1 * 1)))
    s_conv = float(np.sqrt(2.0 / (c0 * 3 * 3)))
    s_fc1 = float(np.sqrt(2.0 / (c0 * hw)))
    s_dec = float(np.sqrt(2.0 / c0))

    w_rgb = np.asarray(raw["w_rgb"]).reshape(c0, cin)     # (co, ci)
    b_rgb = np.asarray(raw["b_rgb"])
    w_conv = np.asarray(raw["w_conv"])                     # (co, ci, 3, 3)
    b_conv = np.asarray(raw["b_conv"])
    w_fc1 = np.asarray(raw["w_fc1"])                       # (c0, c0*hw)
    b_fc1 = np.asarray(raw["b_fc1"])
    w_dec = np.asarray(raw["w_dec"])                       # (latent, c0)
    b_dec = np.asarray(raw["b_dec"])

    # 1) fromRGB as block-diagonal: row = p*cin + ci (NHWC flatten of x, padded
    #    to 128), col = p*c0 + co.
    w1 = np.zeros((LANE, kmid), np.float32)
    blk = w_rgb.T * s_rgb                                  # (ci, co)
    for p in range(hw):
        w1[p * cin:(p + 1) * cin, p * c0:(p + 1) * c0] = blk
    b1 = np.tile(b_rgb * s_rgb, hw).reshape(1, kmid).astype(np.float32)

    # 2) 3x3 conv (padding=1, cross-correlation) as a Toeplitz/stencil matrix:
    #    row = hw_in*c0 + ci, col = hw_out*c0 + co; zero where the tap falls
    #    outside the image (that IS the zero padding).
    w2 = np.zeros((kmid, kmid), np.float32)
    for io in range(h):
        for jo in range(w):
            ho = io * w + jo
            for di in (-1, 0, 1):
                for dj in (-1, 0, 1):
                    ii, jj = io + di, jo + dj
                    if 0 <= ii < h and 0 <= jj < w:
                        hi = ii * w + jj
                        w2[hi * c0:(hi + 1) * c0, ho * c0:(ho + 1) * c0] = (
                            w_conv[:, :, di + 1, dj + 1].T * s_conv)
    b2 = np.tile(b_conv * s_conv, hw).reshape(1, kmid).astype(np.float32)

    # 3) fc1: PyTorch flatten index = c*hw + p; our activation row = p*c0 + c.
    #    (o, c*hw+p) -> reshape (o, c, p) -> transpose (p, c, o) -> (hw*c0, c0).
    w3p = np.transpose(w_fc1.reshape(c0, c0, hw), (2, 1, 0)).reshape(kmid, c0) * s_fc1
    w3 = np.zeros((kmid, LANE), np.float32)
    w3[:, :c0] = w3p
    b3 = np.zeros((1, LANE), np.float32)
    b3[0, :c0] = b_fc1 * s_fc1

    # 4) decision: (latent, c0) -> (c0, latent), padded to (128, 128)
    w4 = np.zeros((LANE, LANE), np.float32)
    w4[:c0, :latent] = w_dec.T * s_dec
    b4 = np.zeros((1, LANE), np.float32)
    b4[0, :latent] = b_dec * s_dec

    return {
        "w1": jnp.asarray(w1, jnp.bfloat16), "b1": jnp.asarray(b1),
        "w2": jnp.asarray(w2, jnp.bfloat16), "b2": jnp.asarray(b2),
        "w3": jnp.asarray(w3, jnp.bfloat16), "b3": jnp.asarray(b3),
        "w4": jnp.asarray(w4, jnp.bfloat16), "b4": jnp.asarray(b4),
    }


# ----------------------------------------------------------------------------
# Pure-JAX reference (matches the PyTorch forward semantics, f32 throughout)
# ----------------------------------------------------------------------------
def reference_forward(raw, x_nchw, *, leak=0.2):
    N, Cin, H, W = x_nchw.shape
    c0 = raw["w_rgb"].shape[0]
    s_rgb = np.sqrt(2.0 / Cin)
    s_conv = np.sqrt(2.0 / (c0 * 9))
    s_fc1 = np.sqrt(2.0 / (c0 * H * W))
    s_dec = np.sqrt(2.0 / c0)
    hi = jax.lax.Precision.HIGHEST
    dn = ("NCHW", "OIHW", "NCHW")

    def lrelu(v):
        return jnp.where(v > 0, v, leak * v)

    y = jax.lax.conv_general_dilated(
        x_nchw, raw["w_rgb"], (1, 1), "VALID", dimension_numbers=dn, precision=hi
    ) + raw["b_rgb"].reshape(1, c0, 1, 1)
    y = lrelu(y * s_rgb)
    y = jax.lax.conv_general_dilated(
        y, raw["w_conv"], (1, 1), ((1, 1), (1, 1)), dimension_numbers=dn, precision=hi
    ) + raw["b_conv"].reshape(1, c0, 1, 1)
    y = lrelu(y * s_conv)
    y = y.reshape(N, -1)
    y = lrelu((jnp.dot(y, raw["w_fc1"].T, precision=hi) + raw["b_fc1"]) * s_fc1)
    y = (jnp.dot(y, raw["w_dec"].T, precision=hi) + raw["b_dec"]) * s_dec
    return y


if __name__ == "__main__":
    key = jax.random.PRNGKey(0)
    kx, kp = jax.random.split(key)

    N, CIN, H, W = 2, 3, 4, 4       # forward implies 4x4 spatial (depthScale0 * 16 flatten)
    C0, LATENT = 32, 64             # depthScale0, latentVectorSize (small synthetic sizes)

    x = jax.random.normal(kx, (N, CIN, H, W), jnp.float32)
    raw = init_raw_params(kp, c0=C0, dim_in=CIN, latent=LATENT)
    packed = pack_params(raw, c0=C0, cin=CIN, latent=LATENT, h=H, w=W)

    fwd = jax.jit(functools.partial(inversion_net_forward, latent=LATENT, leak=0.2))
    out = jax.block_until_ready(fwd(packed, x))
    assert out.shape == (N, LATENT), out.shape

    ref = reference_forward(raw, x)
    err = float(jnp.max(jnp.abs(out - ref))) / (float(jnp.max(jnp.abs(ref))) + 1e-6)
    assert err < 2e-2, f"mismatch vs reference: rel_err={err}"

    print("KERNEL_OK")
</pallas_src>

<mosaic_0001>
module attributes {stable_mosaic.version = 11 : i64} {
  func.func @_inversion_kernel(%arg0: memref<2x128xbf16, #tpu.memory_space<vmem>>, %arg1: memref<128x512xbf16, #tpu.memory_space<vmem>>, %arg2: memref<1x512xf32, #tpu.memory_space<vmem>>, %arg3: memref<512x512xbf16, #tpu.memory_space<vmem>>, %arg4: memref<1x512xf32, #tpu.memory_space<vmem>>, %arg5: memref<512x128xbf16, #tpu.memory_space<vmem>>, %arg6: memref<1x128xf32, #tpu.memory_space<vmem>>, %arg7: memref<128x128xbf16, #tpu.memory_space<vmem>>, %arg8: memref<1x128xf32, #tpu.memory_space<vmem>>, %arg9: memref<2x128xf32, #tpu.memory_space<vmem>>) attributes {dimension_semantics = [], scalar_prefetch = 0 : i64, scratch_operands = 0 : i64, tpu.core_type = #tpu.core_type<tc>} {
    %c0 = arith.constant 0 : index
    %c0_0 = arith.constant 0 : index
    %0 = vector.load %arg0[%c0, %c0_0] : memref<2x128xbf16, #tpu.memory_space<vmem>>, vector<2x128xbf16>
    %c0_1 = arith.constant 0 : index
    %c0_2 = arith.constant 0 : index
    %1 = vector.load %arg1[%c0_1, %c0_2] : memref<128x512xbf16, #tpu.memory_space<vmem>>, vector<128x512xbf16>
    %cst = arith.constant dense<0.000000e+00> : vector<2x512xf32>
    %2 = tpu.matmul %0, %1, %cst {dimension_numbers = #tpu.dot_dimension_numbers<[1], [0], [0], [1], [0, 0, 1, 1], [], []>} : vector<2x128xbf16>, vector<128x512xbf16>, vector<2x512xf32> -> vector<2x512xf32>
    %c0_3 = arith.constant 0 : index
    %c0_4 = arith.constant 0 : index
    %3 = vector.load %arg2[%c0_3, %c0_4] : memref<1x512xf32, #tpu.memory_space<vmem>>, vector<1x512xf32>
    %4 = vector.broadcast %3 : vector<1x512xf32> to vector<2x512xf32>
    %5 = arith.addf %2, %4 : vector<2x512xf32>
    %cst_5 = arith.constant 0.000000e+00 : f32
    %6 = vector.broadcast %cst_5 : f32 to vector<2x512xf32>
    %7 = arith.cmpf ogt, %5, %6 : vector<2x512xf32>
    %cst_6 = arith.constant 2.000000e-01 : f32
    %8 = vector.broadcast %cst_6 : f32 to vector<2x512xf32>
    %9 = arith.mulf %8, %5 : vector<2x512xf32>
    %10 = arith.select %7, %5, %9 : vector<2x512xi1>, vector<2x512xf32>
    %11 = arith.truncf %10 : vector<2x512xf32> to vector<2x512xbf16>
    %c0_7 = arith.constant 0 : index
    %c0_8 = arith.constant 0 : index
    %12 = vector.load %arg3[%c0_7, %c0_8] : memref<512x512xbf16, #tpu.memory_space<vmem>>, vector<512x512xbf16>
    %cst_9 = arith.constant dense<0.000000e+00> : vector<2x512xf32>
    %13 = tpu.matmul %11, %12, %cst_9 {dimension_numbers = #tpu.dot_dimension_numbers<[1], [0], [0], [1], [0, 0, 1, 1], [], []>} : vector<2x512xbf16>, vector<512x512xbf16>, vector<2x512xf32> -> vector<2x512xf32>
    %c0_10 = arith.constant 0 : index
    %c0_11 = arith.constant 0 : index
    %14 = vector.load %arg4[%c0_10, %c0_11] : memref<1x512xf32, #tpu.memory_space<vmem>>, vector<1x512xf32>
    %15 = vector.broadcast %14 : vector<1x512xf32> to vector<2x512xf32>
    %16 = arith.addf %13, %15 : vector<2x512xf32>
    %cst_12 = arith.constant 0.000000e+00 : f32
    %17 = vector.broadcast %cst_12 : f32 to vector<2x512xf32>
    %18 = arith.cmpf ogt, %16, %17 : vector<2x512xf32>
    %cst_13 = arith.constant 2.000000e-01 : f32
    %19 = vector.broadcast %cst_13 : f32 to vector<2x512xf32>
    %20 = arith.mulf %19, %16 : vector<2x512xf32>
    %21 = arith.select %18, %16, %20 : vector<2x512xi1>, vector<2x512xf32>
    %22 = arith.truncf %21 : vector<2x512xf32> to vector<2x512xbf16>
    %c0_14 = arith.constant 0 : index
    %c0_15 = arith.constant 0 : index
    %23 = vector.load %arg5[%c0_14, %c0_15] : memref<512x128xbf16, #tpu.memory_space<vmem>>, vector<512x128xbf16>
    %cst_16 = arith.constant dense<0.000000e+00> : vector<2x128xf32>
    %24 = tpu.matmul %22, %23, %cst_16 {dimension_numbers = #tpu.dot_dimension_numbers<[1], [0], [0], [1], [0, 0, 1, 1], [], []>} : vector<2x512xbf16>, vector<512x128xbf16>, vector<2x128xf32> -> vector<2x128xf32>
    %c0_17 = arith.constant 0 : index
    %c0_18 = arith.constant 0 : index
    %25 = vector.load %arg6[%c0_17, %c0_18] : memref<1x128xf32, #tpu.memory_space<vmem>>, vector<1x128xf32>
    %26 = vector.broadcast %25 : vector<1x128xf32> to vector<2x128xf32>
    %27 = arith.addf %24, %26 : vector<2x128xf32>
    %cst_19 = arith.constant 0.000000e+00 : f32
    %28 = vector.broadcast %cst_19 : f32 to vector<2x128xf32>
    %29 = arith.cmpf ogt, %27, %28 : vector<2x128xf32>
    %cst_20 = arith.constant 2.000000e-01 : f32
    %30 = vector.broadcast %cst_20 : f32 to vector<2x128xf32>
    %31 = arith.mulf %30, %27 : vector<2x128xf32>
    %32 = arith.select %29, %27, %31 : vector<2x128xi1>, vector<2x128xf32>
    %33 = arith.truncf %32 : vector<2x128xf32> to vector<2x128xbf16>
    %c0_21 = arith.constant 0 : index
    %c0_22 = arith.constant 0 : index
    %34 = vector.load %arg7[%c0_21, %c0_22] : memref<128x128xbf16, #tpu.memory_space<vmem>>, vector<128x128xbf16>
    %cst_23 = arith.constant dense<0.000000e+00> : vector<2x128xf32>
    %35 = tpu.matmul %33, %34, %cst_23 {dimension_numbers = #tpu.dot_dimension_numbers<[1], [0], [0], [1], [0, 0, 1, 1], [], []>} : vector<2x128xbf16>, vector<128x128xbf16>, vector<2x128xf32> -> vector<2x128xf32>
    %c0_24 = arith.constant 0 : index
    %c0_25 = arith.constant 0 : index
    %36 = vector.load %arg8[%c0_24, %c0_25] : memref<1x128xf32, #tpu.memory_space<vmem>>, vector<1x128xf32>
    %37 = vector.broadcast %36 : vector<1x128xf32> to vector<2x128xf32>
    %38 = arith.addf %35, %37 : vector<2x128xf32>
    %c0_26 = arith.constant 0 : index
    %c0_27 = arith.constant 0 : index
    %39 = vector.load %arg9[%c0_26, %c0_27] : memref<2x128xf32, #tpu.memory_space<vmem>>, vector<2x128xf32>
    tpu.vector_store %arg9[%c0_26, %c0_27], %38 {strides = array<i32>} : memref<2x128xf32, #tpu.memory_space<vmem>>, vector<2x128xf32>,
    return
  }
}

</mosaic_0001>

<bundles_post_ra>
// kernel: inversion_net_forward.1
= control target key start
LH: loop header
LB: loop body
LE: loop exit
PB: predicated region body
PF: predicated region fallthrough
CT: control target
= control target key end

     0   :  { %14 = vsyncpa [#allocation3], 0  ;;  %s2700_s0 = inlined_call_operand.vmem [shape: bf16[2,128], index: 0, kind: input, shape index: {}]   ;;  %s2701_s1 = inlined_call_operand.hbm [shape: bf16[128,512], index: 1, kind: input, shape index: {}]   ;;  %s2702_s2 = inlined_call_operand.vmem [shape: f32[1,512], index: 2, kind: input, shape index: {}]   ;;  %s2703_s3 = inlined_call_operand.hbm [shape: bf16[512,512], index: 3, kind: input, shape index: {}]   ;;  %s2704_s4 = inlined_call_operand.vmem [shape: f32[1,512], index: 4, kind: input, shape index: {}]   ;;  %s2705_s5 = inlined_call_operand.hbm [shape: bf16[512,128], index: 5, kind: input, shape index: {}]   ;;  %s2706_s6 = inlined_call_operand.vmem [shape: f32[1,128], index: 6, kind: input, shape index: {}]   ;;  %s2707_s7 = inlined_call_operand.vmem [shape: bf16[128,128], index: 7, kind: input, shape index: {}]   ;;  %s2708_s8 = inlined_call_operand.vmem [shape: f32[1,128], index: 8, kind: input, shape index: {}]   ;;  %s2709_s9 = inlined_call_operand.hbm [shape: f32[2,128], index: 9, kind: output, shape index: {}]  }
   0x1   :  { %15 = vsyncpa [#allocation6], 0 }
   0x2   :  { %16 = vsyncpa [#allocation4], 0  ;;  %s2505_s30 = smov [#allocation5]   ;;  %s2506_s11 = smov [#allocation2]  }
   0x3   :  { %s38_s10 = sshll.u32 %s2505_s30, 4  ;;  %s24_s12 = sshll.u32 %s2506_s11, 4  ;;  %s39_s10 = int_to_ptr.vmem [resolvable:$true] %s38_s10  ;;  %s2566_s12 = int_to_ptr.vmem [resolvable:$true] %s24_s12 }
   0x4   :  { %s2411_s15 = scalar_lea.hbm %s2703_s3, 16384 }
   0x5   :  { %p2412_p0 = scmp.ne.s32.totalorder %s2703_s3, %s2411_s15  ;;  %p2415_p1 = scmp.lt.u32.totalorder %s2411_s15, %s2703_s3 }
   0x7   :  { %p2417_p2 = pnand %p2415_p1, %p2412_p0 }
   0x9   :  { %2420 = shalt.err (!%p2417_p2)
}
   0xa   :  { %s2421_s20 = scalar_lea.vmem %s39_s10, 16384  ;;  %p2426_p4 = scmp.lt.s32.totalorder %s39_s10, %s39_s10 }
   0xb   :  { %p2422_p3 = scmp.ne.s32.totalorder %s39_s10, %s2421_s20  ;;  %p2427_p5 = scmp.lt.s32.totalorder %s2421_s20, %s2421_s20 }
   0xd   :  { %p2428_p6 = por %p2427_p5, %p2426_p4 }
   0xf   :  { %p2429_p7 = pnand %p2428_p6, %p2422_p3 }
  0x11   :  { %2432 = shalt.err (!%p2429_p7)
}
  0x12   :  { %s2507_s21 = smov 256   ;;  %s2508_s22 = smov 16  }
  0x13   :  { %44 = dma.hbm_to_vmem [thread:$0]  %s2703_s3, 16384, %s39_s10, [#allocation6], %s2507_s21, %s2507_s21, %s2508_s22  }
  0x14   :  { %s2433_s27 = scalar_lea.hbm %s2701_s1, 4096 }
  0x15   :  { %p2434_p8 = scmp.ne.s32.totalorder %s2701_s1, %s2433_s27  ;;  %p2437_p9 = scmp.lt.u32.totalorder %s2433_s27, %s2701_s1 }
  0x17   :  { %p2439_p10 = pnand %p2437_p9, %p2434_p8 }
  0x19   :  { %2442 = shalt.err (!%p2439_p10)
}
  0x1a   :  { %s2443_s13 = scalar_lea.vmem %s2566_s12, 4096  ;;  %p2448_p12 = scmp.lt.s32.totalorder %s2566_s12, %s2566_s12 }
  0x1b   :  { %p2444_p11 = scmp.ne.s32.totalorder %s2566_s12, %s2443_s13  ;;  %p2449_p13 = scmp.lt.s32.totalorder %s2443_s13, %s2443_s13 }
  0x1d   :  { %p2450_p0 = por %p2449_p13, %p2448_p12 }
  0x1f   :  { %p2451_p1 = pnand %p2450_p0, %p2444_p11 }
  0x21   :  { %2454 = shalt.err (!%p2451_p1)
}
  0x22   :  { %30 = dma.hbm_to_vmem [thread:$0]  %s2701_s1, 4096, %s2566_s12, [#allocation3], %s2507_s21, %s2507_s21, %s2508_s22  }
  0x23   :  { %s2509_s14 = smov [#allocation7]   ;;  %s2455_s18 = scalar_lea.hbm %s2705_s5, 4096 }
  0x24   :  { %s52_s15 = sshll.u32 %s2509_s14, 4  ;;  %p2456_p2 = scmp.ne.s32.totalorder %s2705_s5, %s2455_s18  ;;  %s53_s15 = int_to_ptr.vmem [resolvable:$true] %s52_s15 }
  0x25   :  { %p2459_p3 = scmp.lt.u32.totalorder %s2455_s18, %s2705_s5 }
  0x27   :  { %p2461_p4 = pnand %p2459_p3, %p2456_p2 }
  0x29   :  { %2464 = shalt.err (!%p2461_p4)
}
  0x2a   :  { %s2465_s25 = scalar_lea.vmem %s53_s15, 4096  ;;  %p2470_p6 = scmp.lt.s32.totalorder %s53_s15, %s53_s15 }
  0x2b   :  { %p2466_p5 = scmp.ne.s32.totalorder %s53_s15, %s2465_s25  ;;  %p2471_p7 = scmp.lt.s32.totalorder %s2465_s25, %s2465_s25 }
  0x2d   :  { %p2472_p8 = por %p2471_p7, %p2470_p6 }
  0x2f   :  { %p2473_p9 = pnand %p2472_p8, %p2466_p5 }
  0x31   :  { %2476 = shalt.err (!%p2473_p9)
}
  0x32   :  { %s2510_s1 = smov 64   ;;  %s2511_s12 = smov 4  }
  0x33   :  { %58 = dma.hbm_to_vmem [thread:$0]  %s2705_s5, 4096, %s53_s15, [#allocation6], %s2510_s1, %s2510_s1, %s2511_s12  }
  0x34   :  { %2499 = dma.done.wait [#allocation3], 4096  }
  0x35   :  { %2500 = vsyncadd [#allocation3], 4294963200 }
  0x36   :  { %2501 = dma.done.wait [#allocation6], 20480  }
  0x37   :  { %2502 = vsyncadd [#allocation6], 4294946816  ;;  %v2512_v0 = vmov 0   ;;  %v2131_v1 = vld [vmem:[#allocation2 + $0x4] ss:$16 sps:$4 sm:$0xff]   ;;  %vm2514_vm8 = vmmov 0  }
  0x38   :  { %322 = vmatprep.mubr.bf16.mxu0 %v2512_v0  ;;  %363 = vmatprep.mubr.bf16.mxu1 %v2512_v0  ;;  %v2133_v2 = vld [vmem:[#allocation2] ss:$16 sps:$4 sm:$0xff]   ;;  %v2134_v3 = vld [vmem:[#allocation2 + $0x24] ss:$16 sps:$4 sm:$0xff]   ;;  %v2155_v10 = vld [vmem:[#allocation2 + $0xc] ss:$16 sps:$4 sm:$0xff]  }
  0x39   :  { %290 = vmatprep.subr.bf16.mxu0 %v2131_v1  ;;  %v2136_v4 = vld [vmem:[#allocation2 + $0x20] ss:$16 sps:$4 sm:$0xff]   ;;  %v2137_v5 = vld [vmem:[#allocation2 + $0x44] ss:$16 sps:$4 sm:$0xff]   ;;  %v2157_v11 = vld [vmem:[#allocation2 + $0x8] ss:$16 sps:$4 sm:$0xff]   ;;  %331 = vmatprep.subr.bf16.mxu1 %v2155_v10 }
  0x3a   :  { %291 = vmatpush1.bf16.msra.mxu0 %v2133_v2  ;;  %v2139_v6 = vld [vmem:[#allocation2 + $0x40] ss:$16 sps:$4 sm:$0xff]   ;;  %v2140_v7 = vld [vmem:[#allocation2 + $0x64] ss:$16 sps:$4 sm:$0xff]   ;;  %v2158_v12 = vld [vmem:[#allocation2 + $0x2c] ss:$16 sps:$4 sm:$0xff]   ;;  %332 = vmatpush1.bf16.msra.mxu1 %v2157_v11 }
  0x3b   :  { %292 = vmatprep.subr.bf16.mxu0 %v2134_v3  ;;  %v2142_v8 = vld [vmem:[#allocation2 + $0x60] ss:$16 sps:$4 sm:$0xff]   ;;  %v2143_v9 = vld [vmem:[#allocation2 + $0x84] ss:$16 sps:$4 sm:$0xff]   ;;  %v2160_v14 = vld [vmem:[#allocation2 + $0x28] ss:$16 sps:$4 sm:$0xff]   ;;  %333 = vmatprep.subr.bf16.mxu1 %v2158_v12 }
  0x3c   :  { %v2145_v13 = vld [vmem:[#allocation2 + $0x80] ss:$16 sps:$4 sm:$0xff]   ;;  %v2161_v15 = vld [vmem:[#allocation2 + $0x4c] ss:$16 sps:$4 sm:$0xff]   ;;  %v2146_v16 = vld [vmem:[#allocation2 + $0xa4] ss:$16 sps:$4 sm:$0xff]  }
  0x3d   :  { %v2148_v17 = vld [vmem:[#allocation2 + $0xa0] ss:$16 sps:$4 sm:$0xff]   ;;  %v2163_v18 = vld [vmem:[#allocation2 + $0x48] ss:$16 sps:$4 sm:$0xff]   ;;  %v2164_v19 = vld [vmem:[#allocation2 + $0x6c] ss:$16 sps:$4 sm:$0xff]  }
  0x3e   :  { %293 = vmatpush1.bf16.msra.mxu0 %v2136_v4  ;;  %334 = vmatpush1.bf16.msra.mxu1 %v2160_v14  ;;  %v2149_v20 = vld [vmem:[#allocation2 + $0xc4] ss:$16 sps:$4 sm:$0xff]   ;;  %v2151_v21 = vld [vmem:[#allocation2 + $0xc0] ss:$16 sps:$4 sm:$0xff]   ;;  %v2166_v22 = vld [vmem:[#allocation2 + $0x68] ss:$16 sps:$4 sm:$0xff]  }
  0x3f   :  { %294 = vmatprep.subr.bf16.mxu0 %v2137_v5  ;;  %335 = vmatprep.subr.bf16.mxu1 %v2161_v15  ;;  %v2167_v23 = vld [vmem:[#allocation2 + $0x8c] ss:$16 sps:$4 sm:$0xff]   ;;  %v2152_v24 = vld [vmem:[#allocation2 + $0xe4] ss:$16 sps:$4 sm:$0xff]   ;;  %v2154_v25 = vld [vmem:[#allocation2 + $0xe0] ss:$16 sps:$4 sm:$0xff]  }
  0x40   :  { %v2169_v26 = vld [vmem:[#allocation2 + $0x88] ss:$16 sps:$4 sm:$0xff]   ;;  %v2170_v27 = vld [vmem:[#allocation2 + $0xac] ss:$16 sps:$4 sm:$0xff]   ;;  %v2181_v28 = vld [vmem:[#allocation5 + $0x4] ss:$16 sps:$4 sm:$0xff]  }
  0x41   :  { %v75_v29 = vld [vmem:[%s2700_s0] sm:$0x1]  ;;  %v2172_v30 = vld [vmem:[#allocation2 + $0xa8] ss:$16 sps:$4 sm:$0xff]   ;;  %v2173_v31 = vld [vmem:[#allocation2 + $0xcc] ss:$16 sps:$4 sm:$0xff]  }
  0x42   :  { %295 = vmatpush1.bf16.msra.mxu0 %v2139_v6  ;;  %336 = vmatpush1.bf16.msra.mxu1 %v2163_v18  ;;  %v2179_v32 = vld [vmem:[#allocation5] ss:$16 sps:$4 sm:$0xff]   ;;  %v2187_v33 = vld [vmem:[#allocation5 + $0x24] ss:$16 sps:$4 sm:$0xff]   ;;  %v2175_v34 = vld [vmem:[#allocation2 + $0xc8] ss:$16 sps:$4 sm:$0xff]  }
  0x43   :  { %296 = vmatprep.subr.bf16.mxu0 %v2140_v7  ;;  %337 = vmatprep.subr.bf16.mxu1 %v2164_v19  ;;  %v2176_v35 = vld [vmem:[#allocation2 + $0xec] ss:$16 sps:$4 sm:$0xff]   ;;  %v2185_v36 = vld [vmem:[#allocation5 + $0x20] ss:$16 sps:$4 sm:$0xff]   ;;  %v2193_v37 = vld [vmem:[#allocation5 + $0x44] ss:$16 sps:$4 sm:$0xff]  }
  0x44   :  { %v2178_v38 = vld [vmem:[#allocation2 + $0xe8] ss:$16 sps:$4 sm:$0xff]   ;;  %v2184_v39 = vld [vmem:[#allocation5 + $0xc] ss:$16 sps:$4 sm:$0xff]   ;;  %v2191_v40 = vld [vmem:[#allocation5 + $0x40] ss:$16 sps:$4 sm:$0xff]  }
  0x45   :  { %v2199_v41 = vld [vmem:[#allocation5 + $0x64] ss:$16 sps:$4 sm:$0xff]   ;;  %v2182_v42 = vld [vmem:[#allocation5 + $0x8] ss:$16 sps:$4 sm:$0xff]   ;;  %v2190_v43 = vld [vmem:[#allocation5 + $0x2c] ss:$16 sps:$4 sm:$0xff]  }
  0x46   :  { %297 = vmatpush1.bf16.msra.mxu0 %v2142_v8  ;;  %338 = vmatpush1.bf16.msra.mxu1 %v2166_v22  ;;  %v2197_v44 = vld [vmem:[#allocation5 + $0x60] ss:$16 sps:$4 sm:$0xff]   ;;  %v2205_v45 = vld [vmem:[#allocation5 + $0x84] ss:$16 sps:$4 sm:$0xff]   ;;  %v2188_v46 = vld [vmem:[#allocation5 + $0x28] ss:$16 sps:$4 sm:$0xff]  }
  0x47   :  { %298 = vmatprep.subr.bf16.mxu0 %v2143_v9  ;;  %339 = vmatprep.subr.bf16.mxu1 %v2167_v23  ;;  %v2196_v47 = vld [vmem:[#allocation5 + $0x4c] ss:$16 sps:$4 sm:$0xff]   ;;  %v2203_v48 = vld [vmem:[#allocation5 + $0x80] ss:$16 sps:$4 sm:$0xff]   ;;  %v2211_v49 = vld [vmem:[#allocation5 + $0xa4] ss:$16 sps:$4 sm:$0xff]  }
  0x48   :  { %v2194_v50 = vld [vmem:[#allocation5 + $0x48] ss:$16 sps:$4 sm:$0xff]   ;;  %v2202_v51 = vld [vmem:[#allocation5 + $0x6c] ss:$16 sps:$4 sm:$0xff]   ;;  %v2209_v52 = vld [vmem:[#allocation5 + $0xa0] ss:$16 sps:$4 sm:$0xff]  }
  0x49   :  { %v2217_v53 = vld [vmem:[#allocation5 + $0xc4] ss:$16 sps:$4 sm:$0xff]   ;;  %v2200_v54 = vld [vmem:[#allocation5 + $0x68] ss:$16 sps:$4 sm:$0xff]   ;;  %v2208_v55 = vld [vmem:[#allocation5 + $0x8c] ss:$16 sps:$4 sm:$0xff]  }
  0x4a   :  { %299 = vmatpush1.bf16.msra.mxu0 %v2145_v13  ;;  %340 = vmatpush1.bf16.msra.mxu1 %v2169_v26  ;;  %v2215_v56 = vld [vmem:[#allocation5 + $0xc0] ss:$16 sps:$4 sm:$0xff]   ;;  %v2223_v57 = vld [vmem:[#allocation5 + $0xe4] ss:$16 sps:$4 sm:$0xff]   ;;  %v2206_v58 = vld [vmem:[#allocation5 + $0x88] ss:$16 sps:$4 sm:$0xff]  }
  0x4b   :  { %300 = vmatprep.subr.bf16.mxu0 %v2146_v16  ;;  %341 = vmatprep.subr.bf16.mxu1 %v2170_v27  ;;  %v2214_v59 = vld [vmem:[#allocation5 + $0xac] ss:$16 sps:$4 sm:$0xff]   ;;  %v2221_v60 = vld [vmem:[#allocation5 + $0xe0] ss:$16 sps:$4 sm:$0xff]   ;;  %v2229_v61 = vld [vmem:[#allocation5 + $0x104] ss:$16 sps:$4 sm:$0xff]  }
  0x4c   :  { %v2212_v62 = vld [vmem:[#allocation5 + $0xa8] ss:$16 sps:$4 sm:$0xff]   ;;  %v2220_v63 = vld [vmem:[#allocation5 + $0xcc] ss:$16 sps:$4 sm:$0xff]   ;;  %v2227_v0 = vld [vmem:[#allocation5 + $0x100] ss:$16 sps:$4 sm:$0xff]  }
  0x4d   :  { %v2235_v1 = vld [vmem:[#allocation5 + $0x124] ss:$16 sps:$4 sm:$0xff]   ;;  %v2218_v2 = vld [vmem:[#allocation5 + $0xc8] ss:$16 sps:$4 sm:$0xff]   ;;  %v2226_v3 = vld [vmem:[#allocation5 + $0xec] ss:$16 sps:$4 sm:$0xff]  }
  0x4e   :  { %301 = vmatpush1.bf16.msra.mxu0 %v2148_v17  ;;  %342 = vmatpush1.bf16.msra.mxu1 %v2172_v30  ;;  %v2233_v4 = vld [vmem:[#allocation5 + $0x120] ss:$16 sps:$4 sm:$0xff]   ;;  %v2241_v5 = vld [vmem:[#allocation5 + $0x144] ss:$16 sps:$4 sm:$0xff]   ;;  %v2224_v6 = vld [vmem:[#allocation5 + $0xe8] ss:$16 sps:$4 sm:$0xff]  }
  0x4f   :  { %302 = vmatprep.subr.bf16.mxu0 %v2149_v20  ;;  %343 = vmatprep.subr.bf16.mxu1 %v2173_v31  ;;  %v2232_v7 = vld [vmem:[#allocation5 + $0x10c] ss:$16 sps:$4 sm:$0xff]   ;;  %v2239_v8 = vld [vmem:[#allocation5 + $0x140] ss:$16 sps:$4 sm:$0xff]   ;;  %v2247_v9 = vld [vmem:[#allocation5 + $0x164] ss:$16 sps:$4 sm:$0xff]  }
  0x50   :  { %v2230_v10 = vld [vmem:[#allocation5 + $0x108] ss:$16 sps:$4 sm:$0xff]   ;;  %v2238_v11 = vld [vmem:[#allocation5 + $0x12c] ss:$16 sps:$4 sm:$0xff]   ;;  %v2245_v12 = vld [vmem:[#allocation5 + $0x160] ss:$16 sps:$4 sm:$0xff]  }
  0x51   :  { %v2253_v13 = vld [vmem:[#allocation5 + $0x184] ss:$16 sps:$4 sm:$0xff]   ;;  %v2236_v14 = vld [vmem:[#allocation5 + $0x128] ss:$16 sps:$4 sm:$0xff]   ;;  %v2244_v15 = vld [vmem:[#allocation5 + $0x14c] ss:$16 sps:$4 sm:$0xff]  }
  0x52   :  { %303 = vmatpush1.bf16.msra.mxu0 %v2151_v21  ;;  %344 = vmatpush1.bf16.msra.mxu1 %v2175_v34  ;;  %v2251_v16 = vld [vmem:[#allocation5 + $0x180] ss:$16 sps:$4 sm:$0xff]   ;;  %v2259_v17 = vld [vmem:[#allocation5 + $0x1a4] ss:$16 sps:$4 sm:$0xff]   ;;  %v2242_v18 = vld [vmem:[#allocation5 + $0x148] ss:$16 sps:$4 sm:$0xff]  }
  0x53   :  { %304 = vmatprep.subr.bf16.mxu0 %v2152_v24  ;;  %345 = vmatprep.subr.bf16.mxu1 %v2176_v35  ;;  %v2250_v19 = vld [vmem:[#allocation5 + $0x16c] ss:$16 sps:$4 sm:$0xff]   ;;  %v2257_v20 = vld [vmem:[#allocation5 + $0x1a0] ss:$16 sps:$4 sm:$0xff]   ;;  %v2248_v21 = vld [vmem:[#allocation5 + $0x168] ss:$16 sps:$4 sm:$0xff]  }
  0x54   :  { %v2256_v22 = vld [vmem:[#allocation5 + $0x18c] ss:$16 sps:$4 sm:$0xff]   ;;  %v2254_v23 = vld [vmem:[#allocation5 + $0x188] ss:$16 sps:$4 sm:$0xff]   ;;  %v2265_v26 = vld [vmem:[#allocation5 + $0x1c4] ss:$16 sps:$4 sm:$0xff]  }
  0x55   :  { %v2262_v24 = vld [vmem:[#allocation5 + $0x1ac] ss:$16 sps:$4 sm:$0xff]   ;;  %v2271_v30 = vld [vmem:[#allocation5 + $0x1e4] ss:$16 sps:$4 sm:$0xff]  }
  0x56   :  { %305 = vmatpush1.bf16.msra.mxu0 %v2154_v25  ;;  %346 = vmatpush1.bf16.msra.mxu1 %v2178_v38  ;;  %v2260_v25 = vld [vmem:[#allocation5 + $0x1a8] ss:$16 sps:$4 sm:$0xff]   ;;  %v2268_v27 = vld [vmem:[#allocation5 + $0x1cc] ss:$16 sps:$4 sm:$0xff]   ;;  %v2277_v34 = vld [vmem:[#allocation5 + $0x204] ss:$16 sps:$4 sm:$0xff]  }
  0x57   :  { %1178 = vmatprep.subr.bf16.mxu0 %v2181_v28  ;;  %1260 = vmatprep.subr.bf16.mxu1 %v2184_v39  ;;  %v2263_v28 = vld [vmem:[#allocation5 + $0x1c0] ss:$16 sps:$4 sm:$0xff]   ;;  %v2274_v31 = vld [vmem:[#allocation5 + $0x1ec] ss:$16 sps:$4 sm:$0xff]  }
  0x58   :  { %v2280_v35 = vld [vmem:[#allocation5 + $0x20c] ss:$16 sps:$4 sm:$0xff]   ;;  %v2618_v39 = vld [vmem:[%s2702_s2] sm:$0xf] }
  0x59   :  { %323 = vmatmul.mubr.bf16.vlgmr.msra.gmra.mrb[0].mxu0 %v75_v29  ;;  %364 = vmatmul.mubr.bf16.vlgmr.msra.gmra.mrb[0].mxu1 %v75_v29  ;;  %v2266_v29 = vld [vmem:[#allocation5 + $0x1c8] ss:$16 sps:$4 sm:$0xff]  }
  0x5a   :  { %1179 = vmatpush1.bf16.msra.mxu0 %v2179_v32  ;;  %1261 = vmatpush1.bf16.msra.mxu1 %v2182_v42  ;;  %v2269_v32 = vld [vmem:[#allocation5 + $0x1e0] ss:$16 sps:$4 sm:$0xff]  }
  0x5b   :  { %1180 = vmatprep.subr.bf16.mxu0 %v2187_v33  ;;  %1262 = vmatprep.subr.bf16.mxu1 %v2190_v43  ;;  %v2272_v33 = vld [vmem:[#allocation5 + $0x1e8] ss:$16 sps:$4 sm:$0xff]  }
  0x5e   :  { %1181 = vmatpush1.bf16.msra.mxu0 %v2185_v36  ;;  %1263 = vmatpush1.bf16.msra.mxu1 %v2188_v46  ;;  %v110_v36 = vlaneseq }
  0x5f   :  { %1182 = vmatprep.subr.bf16.mxu0 %v2193_v37  ;;  %1264 = vmatprep.subr.bf16.mxu1 %v2196_v47 }
  0x60   :  { %v2612_v37 = vshrl.u32 %v110_v36, 7  ;;  %v2334_v36 = vld [vmem:[#allocation5 + $0x32c] ss:$16 sps:$4 sm:$0xff]  }
  0x62   :  { %1183 = vmatpush1.bf16.msra.mxu0 %v2191_v40  ;;  %1265 = vmatpush1.bf16.msra.mxu1 %v2194_v50  ;;  %v112_v38 = vsub.s32 0, %v2612_v37  ;;  %v116_v40 = vsub.s32 1, %v2612_v37 }
  0x63   :  { %1184 = vmatprep.subr.bf16.mxu0 %v2199_v41  ;;  %1266 = vmatprep.subr.bf16.mxu1 %v2202_v51 }
  0x64   :  { %v113_v41 = vrot.slane %v2618_v39, %v112_v38  ;;  %v117_v42 = vrot.slane %v2618_v39, %v116_v40 }
  0x66   :  { %1185 = vmatpush1.bf16.msra.mxu0 %v2197_v44  ;;  %1267 = vmatpush1.bf16.msra.mxu1 %v2200_v54 }
  0x67   :  { %1186 = vmatprep.subr.bf16.mxu0 %v2205_v45  ;;  %1268 = vmatprep.subr.bf16.mxu1 %v2208_v55  ;;  %v2275_v55 = vld [vmem:[#allocation5 + $0x200] ss:$16 sps:$4 sm:$0xff]  }
  0x6a   :  { %1187 = vmatpush1.bf16.msra.mxu0 %v2203_v48  ;;  %1269 = vmatpush1.bf16.msra.mxu1 %v2206_v58  ;;  %v2283_v58 = vld [vmem:[#allocation5 + $0x224] ss:$16 sps:$4 sm:$0xff]  }
  0x6b   :  { %1188 = vmatprep.subr.bf16.mxu0 %v2211_v49  ;;  %1270 = vmatprep.subr.bf16.mxu1 %v2214_v59  ;;  %v2286_v59 = vld [vmem:[#allocation5 + $0x22c] ss:$16 sps:$4 sm:$0xff]  }
  0x6e   :  { %1189 = vmatpush1.bf16.msra.mxu0 %v2209_v52  ;;  %1271 = vmatpush1.bf16.msra.mxu1 %v2212_v62  ;;  %v124_v52 = vsub.s32 3, %v2612_v37  ;;  %v2284_v62 = vld [vmem:[#allocation5 + $0x228] ss:$16 sps:$4 sm:$0xff]  }
  0x6f   :  { %1190 = vmatprep.subr.bf16.mxu0 %v2217_v53  ;;  %1272 = vmatprep.subr.bf16.mxu1 %v2220_v63 }
  0x72   :  { %1191 = vmatpush1.bf16.msra.mxu0 %v2215_v56  ;;  %1273 = vmatpush1.bf16.msra.mxu1 %v2218_v2  ;;  %v2278_v56 = vld [vmem:[#allocation5 + $0x208] ss:$16 sps:$4 sm:$0xff]  }
  0x73   :  { %1192 = vmatprep.subr.bf16.mxu0 %v2223_v57  ;;  %1274 = vmatprep.subr.bf16.mxu1 %v2226_v3 }
  0x76   :  { %1193 = vmatpush1.bf16.msra.mxu0 %v2221_v60  ;;  %1275 = vmatpush1.bf16.msra.mxu1 %v2224_v6  ;;  %v125_v60 = vrot.slane %v2618_v39, %v124_v52 }
  0x77   :  { %1194 = vmatprep.subr.bf16.mxu0 %v2229_v61  ;;  %1276 = vmatprep.subr.bf16.mxu1 %v2232_v7  ;;  %v2281_v61 = vld [vmem:[#allocation5 + $0x220] ss:$16 sps:$4 sm:$0xff]   ;;  %v2290_v7 = vld [vmem:[#allocation5 + $0x248] ss:$16 sps:$4 sm:$0xff]  }
  0x7a   :  { %1195 = vmatpush1.bf16.msra.mxu0 %v2227_v0  ;;  %1277 = vmatpush1.bf16.msra.mxu1 %v2230_v10  ;;  %v2289_v0 = vld [vmem:[#allocation5 + $0x244] ss:$16 sps:$4 sm:$0xff]   ;;  %v2298_v10 = vld [vmem:[#allocation5 + $0x26c] ss:$16 sps:$4 sm:$0xff]  }
  0x7b   :  { %1196 = vmatprep.subr.bf16.mxu0 %v2235_v1  ;;  %1278 = vmatprep.subr.bf16.mxu1 %v2238_v11  ;;  %v2292_v1 = vld [vmem:[#allocation5 + $0x24c] ss:$16 sps:$4 sm:$0xff]  }
  0x7e   :  { %1197 = vmatpush1.bf16.msra.mxu0 %v2233_v4  ;;  %1279 = vmatpush1.bf16.msra.mxu1 %v2236_v14  ;;  %v2296_v14 = vld [vmem:[#allocation5 + $0x268] ss:$16 sps:$4 sm:$0xff]  }
  0x7f   :  { %1198 = vmatprep.subr.bf16.mxu0 %v2241_v5  ;;  %1280 = vmatprep.subr.bf16.mxu1 %v2244_v15  ;;  %v2287_v5 = vld [vmem:[#allocation5 + $0x240] ss:$16 sps:$4 sm:$0xff]   ;;  %v2301_v15 = vld [vmem:[#allocation5 + $0x284] ss:$16 sps:$4 sm:$0xff]  }
  0x82   :  { %1199 = vmatpush1.bf16.msra.mxu0 %v2239_v8  ;;  %1281 = vmatpush1.bf16.msra.mxu1 %v2242_v18  ;;  %v2302_v18 = vld [vmem:[#allocation5 + $0x288] ss:$16 sps:$4 sm:$0xff]  }
  0x83   :  { %1200 = vmatprep.subr.bf16.mxu0 %v2247_v9  ;;  %1282 = vmatprep.subr.bf16.mxu1 %v2250_v19  ;;  %v2295_v9 = vld [vmem:[#allocation5 + $0x264] ss:$16 sps:$4 sm:$0xff]  }
  0x84   :  { %v2307_v19 = vld [vmem:[#allocation5 + $0x2a4] ss:$16 sps:$4 sm:$0xff]  }
  0x86   :  { %1201 = vmatpush1.bf16.msra.mxu0 %v2245_v12  ;;  %1283 = vmatpush1.bf16.msra.mxu1 %v2248_v21  ;;  %v2305_v21 = vld [vmem:[#allocation5 + $0x2a0] ss:$16 sps:$4 sm:$0xff]  }
  0x87   :  { %1202 = vmatprep.subr.bf16.mxu0 %v2253_v13  ;;  %1284 = vmatprep.subr.bf16.mxu1 %v2256_v22  ;;  %v2293_v13 = vld [vmem:[#allocation5 + $0x260] ss:$16 sps:$4 sm:$0xff]   ;;  %v2308_v22 = vld [vmem:[#allocation5 + $0x2a8] ss:$16 sps:$4 sm:$0xff]  }
  0x8a   :  { %1203 = vmatpush1.bf16.msra.mxu0 %v2251_v16  ;;  %1285 = vmatpush1.bf16.msra.mxu1 %v2254_v23  ;;  %v2304_v16 = vld [vmem:[#allocation5 + $0x28c] ss:$16 sps:$4 sm:$0xff]   ;;  %v2313_v23 = vld [vmem:[#allocation5 + $0x2c4] ss:$16 sps:$4 sm:$0xff]  }
  0x8b   :  { %1204 = vmatprep.subr.bf16.mxu0 %v2259_v17  ;;  %1286 = vmatprep.subr.bf16.mxu1 %v2262_v24  ;;  %v2299_v17 = vld [vmem:[#allocation5 + $0x280] ss:$16 sps:$4 sm:$0xff]   ;;  %v2316_v24 = vld [vmem:[#allocation5 + $0x2cc] ss:$16 sps:$4 sm:$0xff]  }
  0x8e   :  { %1205 = vmatpush1.bf16.msra.mxu0 %v2257_v20  ;;  %1287 = vmatpush1.bf16.msra.mxu1 %v2260_v25  ;;  %v2310_v20 = vld [vmem:[#allocation5 + $0x2ac] ss:$16 sps:$4 sm:$0xff]   ;;  %v2311_v25 = vld [vmem:[#allocation5 + $0x2c0] ss:$16 sps:$4 sm:$0xff]  }
  0x8f   :  { %1206 = vmatprep.subr.bf16.mxu0 %v2265_v26  ;;  %1288 = vmatprep.subr.bf16.mxu1 %v2268_v27  ;;  %v2314_v26 = vld [vmem:[#allocation5 + $0x2c8] ss:$16 sps:$4 sm:$0xff]   ;;  %v2319_v27 = vld [vmem:[#allocation5 + $0x2e4] ss:$16 sps:$4 sm:$0xff]  }
  0x92   :  { %1207 = vmatpush1.bf16.msra.mxu0 %v2263_v28  ;;  %1289 = vmatpush1.bf16.msra.mxu1 %v2266_v29  ;;  %v2322_v28 = vld [vmem:[#allocation5 + $0x2ec] ss:$16 sps:$4 sm:$0xff]   ;;  %v2317_v29 = vld [vmem:[#allocation5 + $0x2e0] ss:$16 sps:$4 sm:$0xff]  }
  0x93   :  { %1208 = vmatprep.subr.bf16.mxu0 %v2271_v30  ;;  %1290 = vmatprep.subr.bf16.mxu1 %v2274_v31  ;;  %v2320_v30 = vld [vmem:[#allocation5 + $0x2e8] ss:$16 sps:$4 sm:$0xff]   ;;  %v2325_v31 = vld [vmem:[#allocation5 + $0x304] ss:$16 sps:$4 sm:$0xff]  }
  0x96   :  { %1209 = vmatpush1.bf16.msra.mxu0 %v2269_v32  ;;  %1291 = vmatpush1.bf16.msra.mxu1 %v2272_v33  ;;  %v2328_v32 = vld [vmem:[#allocation5 + $0x30c] ss:$16 sps:$4 sm:$0xff]   ;;  %v2323_v33 = vld [vmem:[#allocation5 + $0x300] ss:$16 sps:$4 sm:$0xff]  }
  0x97   :  { %1219 = vmatprep.subr.bf16.mxu0 %v2277_v34  ;;  %1301 = vmatprep.subr.bf16.mxu1 %v2280_v35  ;;  %v2326_v34 = vld [vmem:[#allocation5 + $0x308] ss:$16 sps:$4 sm:$0xff]   ;;  %v2331_v35 = vld [vmem:[#allocation5 + $0x324] ss:$16 sps:$4 sm:$0xff]  }
 0x12c   :  { %v324_v43 = vpop.f32.mrb[0].mxu0  ;;  %v2631_v63 = vpop.f32.mrb[0].mxu1 }
 0x12d   :  { %v325_v44 = vadd.f32 %v324_v43, %v113_v41  ;;  %v326_v45 = vpop.f32.mrb[1].mxu0  ;;  %v367_v2 = vpop.f32.mrb[1].mxu1  ;;  %v2329_v41 = vld [vmem:[#allocation5 + $0x320] ss:$16 sps:$4 sm:$0xff]   ;;  %v2337_v43 = vld [vmem:[#allocation5 + $0x344] ss:$16 sps:$4 sm:$0xff]  }
 0x12e   :  { %v327_v46 = vadd.f32 %v326_v45, %v117_v42  ;;  %v328_v47 = vpop.f32.mrb[2].mxu0  ;;  %v368_v3 = vadd.f32 %v367_v2, %v125_v60  ;;  %v369_v4 = vpop.f32.mrb[2].mxu1  ;;  %v2332_v42 = vld [vmem:[#allocation5 + $0x328] ss:$16 sps:$4 sm:$0xff]   ;;  %v2335_v45 = vld [vmem:[#allocation5 + $0x340] ss:$16 sps:$4 sm:$0xff]  }
 0x12f   :  { %vm372_vm0 = vcmp.gt.f32.partialorder %v325_v44, 0.0  ;;  %v376_v48 = vmul.f32 0.2, %v325_v44  ;;  %v329_v49 = vpop.f32.mrb[3].mxu0  ;;  %v370_v6 = vpop.f32.mrb[3].mxu1 }
 0x130   :  { %vm373_vm1 = vcmp.gt.f32.partialorder %v327_v46, 0.0  ;;  %v377_v50 = vmul.f32 0.2, %v327_v46  ;;  %vm375_vm2 = vcmp.gt.f32.partialorder %v368_v3, 0.0  ;;  %v379_v8 = vmul.f32 0.2, %v368_v3 }
 0x131   :  { %v380_v51 = vsel %vm372_vm0, %v325_v44, %v376_v48  ;;  %v2340_v44 = vld [vmem:[#allocation5 + $0x34c] ss:$16 sps:$4 sm:$0xff]   ;;  %v2343_v47 = vld [vmem:[#allocation5 + $0x364] ss:$16 sps:$4 sm:$0xff]   ;;  %v2341_v49 = vld [vmem:[#allocation5 + $0x360] ss:$16 sps:$4 sm:$0xff]  }
 0x132   :  { %v381_v53 = vsel %vm373_vm1, %v327_v46, %v377_v50  ;;  %v384_v57 = vpack.c.bf16 %v380_v51, %v380_v51  ;;  %v383_v11 = vsel %vm375_vm2, %v368_v3, %v379_v8  ;;  %v2338_v46 = vld [vmem:[#allocation5 + $0x348] ss:$16 sps:$4 sm:$0xff]   ;;  %v2346_v48 = vld [vmem:[#allocation5 + $0x36c] ss:$16 sps:$4 sm:$0xff]   ;;  %v2349_v51 = vld [vmem:[#allocation5 + $0x384] ss:$16 sps:$4 sm:$0xff]  }
 0x133   :  { %v385_v54 = vpack.c.bf16 %v381_v53, %v381_v53  ;;  %v387_v12 = vpack.c.bf16 %v383_v11, %v383_v11  ;;  %v2344_v50 = vld [vmem:[#allocation5 + $0x368] ss:$16 sps:$4 sm:$0xff]   ;;  %v2352_v53 = vld [vmem:[#allocation5 + $0x38c] ss:$16 sps:$4 sm:$0xff]   ;;  %v2353_v60 = vld [vmem:[#allocation5 + $0x3a0] ss:$16 sps:$4 sm:$0xff]  }
 0x134   :  { %v2359_v2 = vld [vmem:[#allocation5 + $0x3c0] ss:$16 sps:$4 sm:$0xff]   ;;  %v2362_v3 = vld [vmem:[#allocation5 + $0x3c8] ss:$16 sps:$4 sm:$0xff]   ;;  %v2367_v4 = vld [vmem:[#allocation5 + $0x3e4] ss:$16 sps:$4 sm:$0xff]  }
 0x135   :  { %1210 = vmatprep.mubr.bf16.mxu0 %v385_v54  ;;  %1292 = vmatprep.mubr.bf16.mxu1 %v385_v54  ;;  %v120_v54 = vsub.s32 2, %v2612_v37  ;;  %v2371_v8 = vld [vmem:[#allocation7 + $0x40] sm:$0xff]  }
 0x136   :  { %1211 = vmatmul.mubr.bf16.vlgmr.msra.gmra.mrb[4].mxu0 %v384_v57  ;;  %1293 = vmatmul.mubr.bf16.vlgmr.msra.gmra.mrb[4].mxu1 %v384_v57  ;;  %v2355_v57 = vld [vmem:[#allocation5 + $0x3a4] ss:$16 sps:$4 sm:$0xff]  }
 0x137   :  { %1220 = vmatpush1.bf16.msra.mxu0 %v2275_v55  ;;  %1302 = vmatpush1.bf16.msra.mxu1 %v2278_v56  ;;  %v2347_v55 = vld [vmem:[#allocation5 + $0x380] ss:$16 sps:$4 sm:$0xff]   ;;  %v2350_v56 = vld [vmem:[#allocation5 + $0x388] ss:$16 sps:$4 sm:$0xff]  }
 0x138   :  { %1221 = vmatprep.subr.bf16.mxu0 %v2283_v58  ;;  %1303 = vmatprep.subr.bf16.mxu1 %v2286_v59  ;;  %v2358_v58 = vld [vmem:[#allocation5 + $0x3ac] ss:$16 sps:$4 sm:$0xff]   ;;  %v121_v59 = vrot.slane %v2618_v39, %v120_v54  ;;  %v2365_v39 = vld [vmem:[#allocation5 + $0x3e0] ss:$16 sps:$4 sm:$0xff]  }
 0x139   :  { %1251 = vmatprep.mubr.bf16.mxu0 %v387_v12  ;;  %1333 = vmatprep.mubr.bf16.mxu1 %v387_v12  ;;  %v2374_v11 = vld [vmem:[#allocation7 + $0x80] sm:$0xff]  }
 0x13b   :  { %1222 = vmatpush1.bf16.msra.mxu0 %v2281_v61  ;;  %1304 = vmatpush1.bf16.msra.mxu1 %v2284_v62  ;;  %v2356_v61 = vld [vmem:[#allocation5 + $0x3a8] ss:$16 sps:$4 sm:$0xff]   ;;  %v2361_v62 = vld [vmem:[#allocation5 + $0x3c4] ss:$16 sps:$4 sm:$0xff]  }
 0x13c   :  { %1223 = vmatprep.subr.bf16.mxu0 %v2289_v0  ;;  %1305 = vmatprep.subr.bf16.mxu1 %v2292_v1  ;;  %v2364_v0 = vld [vmem:[#allocation5 + $0x3cc] ss:$16 sps:$4 sm:$0xff]   ;;  %v366_v1 = vadd.f32 %v2631_v63, %v121_v59  ;;  %v2373_v63 = vld [vmem:[#allocation7] sm:$0xff]  }
 0x13e   :  { %v378_v6 = vmul.f32 0.2, %v366_v1  ;;  %vm374_vm3 = vcmp.gt.f32.partialorder %v366_v1, 0.0 }
 0x13f   :  { %1224 = vmatpush1.bf16.msra.mxu0 %v2287_v5  ;;  %1306 = vmatpush1.bf16.msra.mxu1 %v2290_v7  ;;  %v2370_v5 = vld [vmem:[#allocation5 + $0x3ec] ss:$16 sps:$4 sm:$0xff]   ;;  %v2368_v7 = vld [vmem:[#allocation5 + $0x3e8] ss:$16 sps:$4 sm:$0xff]  }
 0x140   :  { %1225 = vmatprep.subr.bf16.mxu0 %v2295_v9  ;;  %1307 = vmatprep.subr.bf16.mxu1 %v2298_v10  ;;  %v2372_v9 = vld [vmem:[#allocation7 + $0xc0] sm:$0xff]   ;;  %v382_v10 = vsel %vm374_vm3, %v366_v1, %v378_v6 }
 0x141   :  { %v386_v12 = vpack.c.bf16 %v382_v10, %v382_v10  ;;  %v2405_v10 = vld [vmem:[%s2707_s7 + $0x10] sm:$0xff]  }
 0x143   :  { %1226 = vmatpush1.bf16.msra.mxu0 %v2293_v13  ;;  %1308 = vmatpush1.bf16.msra.mxu1 %v2296_v14  ;;  %v2375_v13 = vld [vmem:[#allocation7 + $0x48] sm:$0xff]  }
 0x144   :  { %1227 = vmatprep.subr.bf16.mxu0 %v2301_v15  ;;  %1309 = vmatprep.subr.bf16.mxu1 %v2304_v16  ;;  %v2376_v14 = vld [vmem:[#allocation7 + $0xc8] sm:$0xff]  }
 0x145   :  { %v2377_v15 = vld [vmem:[#allocation7 + $0x8] sm:$0xff]  }
 0x146   :  { %v2378_v16 = vld [vmem:[#allocation7 + $0x88] sm:$0xff]  }
 0x147   :  { %1228 = vmatpush1.bf16.msra.mxu0 %v2299_v17  ;;  %1310 = vmatpush1.bf16.msra.mxu1 %v2302_v18  ;;  %v2379_v17 = vld [vmem:[#allocation7 + $0x50] sm:$0xff]  }
 0x148   :  { %1229 = vmatprep.subr.bf16.mxu0 %v2307_v19  ;;  %1311 = vmatprep.subr.bf16.mxu1 %v2310_v20  ;;  %v2380_v18 = vld [vmem:[#allocation7 + $0xd0] sm:$0xff]  }
 0x149   :  { %v2381_v19 = vld [vmem:[#allocation7 + $0x10] sm:$0xff]  }
 0x14a   :  { %v2382_v20 = vld [vmem:[#allocation7 + $0x90] sm:$0xff]  }
 0x14b   :  { %1230 = vmatpush1.bf16.msra.mxu0 %v2305_v21  ;;  %1312 = vmatpush1.bf16.msra.mxu1 %v2308_v22  ;;  %v2383_v21 = vld [vmem:[#allocation7 + $0x58] sm:$0xff]  }
 0x14c   :  { %1231 = vmatprep.subr.bf16.mxu0 %v2313_v23  ;;  %1313 = vmatprep.subr.bf16.mxu1 %v2316_v24  ;;  %v2384_v22 = vld [vmem:[#allocation7 + $0xd8] sm:$0xff]  }
 0x14d   :  { %v2385_v23 = vld [vmem:[#allocation7 + $0x18] sm:$0xff]  }
 0x14e   :  { %v2386_v24 = vld [vmem:[#allocation7 + $0x98] sm:$0xff]  }
 0x14f   :  { %1232 = vmatpush1.bf16.msra.mxu0 %v2311_v25  ;;  %1314 = vmatpush1.bf16.msra.mxu1 %v2314_v26  ;;  %v2387_v25 = vld [vmem:[#allocation7 + $0x60] sm:$0xff]  }
 0x150   :  { %1233 = vmatprep.subr.bf16.mxu0 %v2319_v27  ;;  %1315 = vmatprep.subr.bf16.mxu1 %v2322_v28  ;;  %v2388_v26 = vld [vmem:[#allocation7 + $0xe0] sm:$0xff]  }
 0x151   :  { %v2389_v27 = vld [vmem:[#allocation7 + $0x20] sm:$0xff]  }
 0x152   :  { %v2390_v28 = vld [vmem:[#allocation7 + $0xa0] sm:$0xff]  }
 0x153   :  { %1234 = vmatpush1.bf16.msra.mxu0 %v2317_v29  ;;  %1316 = vmatpush1.bf16.msra.mxu1 %v2320_v30  ;;  %v2391_v29 = vld [vmem:[#allocation7 + $0x68] sm:$0xff]  }
 0x154   :  { %1235 = vmatprep.subr.bf16.mxu0 %v2325_v31  ;;  %1317 = vmatprep.subr.bf16.mxu1 %v2328_v32  ;;  %v2392_v30 = vld [vmem:[#allocation7 + $0xe8] sm:$0xff]  }
 0x155   :  { %v2393_v31 = vld [vmem:[#allocation7 + $0x28] sm:$0xff]  }
 0x156   :  { %v2394_v32 = vld [vmem:[#allocation7 + $0xa8] sm:$0xff]  }
 0x157   :  { %1236 = vmatpush1.bf16.msra.mxu0 %v2323_v33  ;;  %1318 = vmatpush1.bf16.msra.mxu1 %v2326_v34  ;;  %v2395_v33 = vld [vmem:[#allocation7 + $0x70] sm:$0xff]  }
 0x158   :  { %1237 = vmatprep.subr.bf16.mxu0 %v2331_v35  ;;  %1319 = vmatprep.subr.bf16.mxu1 %v2334_v36  ;;  %v2396_v34 = vld [vmem:[#allocation7 + $0xf0] sm:$0xff]  }
 0x159   :  { %v2397_v35 = vld [vmem:[#allocation7 + $0x30] sm:$0xff]  }
 0x15a   :  { %v2398_v36 = vld [vmem:[#allocation7 + $0xb0] sm:$0xff]  }
 0x15b   :  { %1238 = vmatpush1.bf16.msra.mxu0 %v2329_v41  ;;  %1320 = vmatpush1.bf16.msra.mxu1 %v2332_v42  ;;  %v2399_v41 = vld [vmem:[#allocation7 + $0x78] sm:$0xff]  }
 0x15c   :  { %1239 = vmatprep.subr.bf16.mxu0 %v2337_v43  ;;  %1321 = vmatprep.subr.bf16.mxu1 %v2340_v44  ;;  %v2400_v42 = vld [vmem:[#allocation7 + $0xf8] sm:$0xff]  }
 0x15d   :  { %v2401_v43 = vld [vmem:[#allocation7 + $0x38] sm:$0xff]  }
 0x15e   :  { %v2402_v44 = vld [vmem:[#allocation7 + $0xb8] sm:$0xff]  }
 0x15f   :  { %1240 = vmatpush1.bf16.msra.mxu0 %v2335_v45  ;;  %1322 = vmatpush1.bf16.msra.mxu1 %v2338_v46  ;;  %v2513_v45 = vmov 0.0   ;;  %v516_v46 = vld [vmem:[%s2704_s4] sm:$0xf] }
 0x160   :  { %1241 = vmatprep.subr.bf16.mxu0 %v2343_v47  ;;  %1323 = vmatprep.subr.bf16.mxu1 %v2346_v48  ;;  %v521_v47 = vrot.slane %v516_v46, %v112_v38  ;;  %v529_v48 = vrot.slane %v516_v46, %v120_v54 }
 0x163   :  { %1242 = vmatpush1.bf16.msra.mxu0 %v2341_v49  ;;  %1324 = vmatpush1.bf16.msra.mxu1 %v2344_v50  ;;  %v525_v49 = vrot.slane %v516_v46, %v116_v40  ;;  %v533_v50 = vrot.slane %v516_v46, %v124_v52 }
 0x164   :  { %1243 = vmatprep.subr.bf16.mxu0 %v2349_v51  ;;  %1325 = vmatprep.subr.bf16.mxu1 %v2352_v53 }
 0x167   :  { %1244 = vmatpush1.bf16.msra.mxu0 %v2347_v55  ;;  %1326 = vmatpush1.bf16.msra.mxu1 %v2350_v56 }
 0x168   :  { %1245 = vmatprep.subr.bf16.mxu0 %v2355_v57  ;;  %1327 = vmatprep.subr.bf16.mxu1 %v2358_v58 }
 0x16b   :  { %1246 = vmatpush1.bf16.msra.mxu0 %v2353_v60  ;;  %1328 = vmatpush1.bf16.msra.mxu1 %v2356_v61 }
 0x16c   :  { %1247 = vmatprep.subr.bf16.mxu0 %v2361_v62  ;;  %1329 = vmatprep.subr.bf16.mxu1 %v2364_v0 }
 0x16f   :  { %1248 = vmatpush1.bf16.msra.mxu0 %v2359_v2  ;;  %1330 = vmatpush1.bf16.msra.mxu1 %v2362_v3 }
 0x170   :  { %1249 = vmatprep.subr.bf16.mxu0 %v2367_v4  ;;  %1331 = vmatprep.subr.bf16.mxu1 %v2370_v5 }
 0x173   :  { %1250 = vmatpush1.bf16.msra.mxu0 %v2365_v39  ;;  %1332 = vmatpush1.bf16.msra.mxu1 %v2368_v7  ;;  %v2403_v39 = vld [vmem:[%s2707_s7] sm:$0xff]  }
 0x174   :  { %2035 = vmatprep.subr.bf16.mxu0 %v2371_v8  ;;  %2057 = vmatprep.subr.bf16.mxu1 %v2372_v9  ;;  %v2404_v9 = vld [vmem:[%s2707_s7 + $0x8] sm:$0xff]  }
 0x176   :  { %1252 = vmatmul.mubr.bf16.vlgmr.msra.gmra.mrb[4].mxu0 %v386_v12  ;;  %1334 = vmatmul.mubr.bf16.vlgmr.msra.gmra.mrb[4].mxu1 %v386_v12  ;;  %v2408_v12 = vld [vmem:[%s2707_s7 + $0x28] sm:$0xff]  }
 0x177   :  { %2036 = vmatpush3.bf16.msra.mxu0 %v2373_v63  ;;  %2058 = vmatpush3.bf16.msra.mxu1 %v2374_v11  ;;  %v2406_v63 = vld [vmem:[%s2707_s7 + $0x18] sm:$0xff]   ;;  %v2407_v11 = vld [vmem:[%s2707_s7 + $0x20] sm:$0xff]  }
 0x178   :  { %2037 = vmatprep.subr.bf16.mxu0 %v2375_v13  ;;  %2059 = vmatprep.subr.bf16.mxu1 %v2376_v14  ;;  %v2409_v13 = vld [vmem:[%s2707_s7 + $0x30] sm:$0xff]   ;;  %v2410_v14 = vld [vmem:[%s2707_s7 + $0x38] sm:$0xff]  }
 0x17b   :  { %2038 = vmatpush3.bf16.msra.mxu0 %v2377_v15  ;;  %2060 = vmatpush3.bf16.msra.mxu1 %v2378_v16 }
 0x17c   :  { %2039 = vmatprep.subr.bf16.mxu0 %v2379_v17  ;;  %2061 = vmatprep.subr.bf16.mxu1 %v2380_v18  ;;  %v1993_v17 = vld [vmem:[%s2706_s6] ss:$0 sm:$0xff]  ;;  %s2515_s6 = smov [#allocation8]  }
 0x17d   :  { %s1823_s21 = sshll.u32 %s2515_s6, 4  ;;  %s1824_s21 = int_to_ptr.vmem [resolvable:$true] %s1823_s21 }
 0x17e   :  { %s2477_s22 = scalar_lea.vmem %s1824_s21, 32  ;;  %p2482_p11 = scmp.lt.s32.totalorder %s1824_s21, %s1824_s21 }
 0x17f   :  { %2040 = vmatpush3.bf16.msra.mxu0 %v2381_v19  ;;  %2062 = vmatpush3.bf16.msra.mxu1 %v2382_v20  ;;  %p2478_p10 = scmp.ne.s32.totalorder %s1824_s21, %s2477_s22  ;;  %p2483_p12 = scmp.lt.s32.totalorder %s2477_s22, %s2477_s22 }
 0x180   :  { %2041 = vmatprep.subr.bf16.mxu0 %v2383_v21  ;;  %2063 = vmatprep.subr.bf16.mxu1 %v2384_v22 }
 0x181   :  { %p2484_p13 = por %p2483_p12, %p2482_p11 }
 0x183   :  { %2042 = vmatpush3.bf16.msra.mxu0 %v2385_v23  ;;  %2064 = vmatpush3.bf16.msra.mxu1 %v2386_v24  ;;  %p2485_p0 = pnand %p2484_p13, %p2478_p10 }
 0x184   :  { %2043 = vmatprep.subr.bf16.mxu0 %v2387_v25  ;;  %2065 = vmatprep.subr.bf16.mxu1 %v2388_v26 }
 0x187   :  { %2044 = vmatpush3.bf16.msra.mxu0 %v2389_v27  ;;  %2066 = vmatpush3.bf16.msra.mxu1 %v2390_v28 }
 0x188   :  { %2045 = vmatprep.subr.bf16.mxu0 %v2391_v29  ;;  %2067 = vmatprep.subr.bf16.mxu1 %v2392_v30 }
 0x18b   :  { %2046 = vmatpush3.bf16.msra.mxu0 %v2393_v31  ;;  %2068 = vmatpush3.bf16.msra.mxu1 %v2394_v32  ;;  %v2026_v31 = vld [vmem:[%s2708_s8] ss:$0 sm:$0xff] }
 0x18c   :  { %2047 = vmatprep.subr.bf16.mxu0 %v2395_v33  ;;  %2069 = vmatprep.subr.bf16.mxu1 %v2396_v34 }
 0x18f   :  { %2048 = vmatpush3.bf16.msra.mxu0 %v2397_v35  ;;  %2070 = vmatpush3.bf16.msra.mxu1 %v2398_v36 }
 0x190   :  { %2049 = vmatprep.subr.bf16.mxu0 %v2399_v41  ;;  %2071 = vmatprep.subr.bf16.mxu1 %v2400_v42 }
 0x193   :  { %2050 = vmatpush3.bf16.msra.mxu0 %v2401_v43  ;;  %2072 = vmatpush3.bf16.msra.mxu1 %v2402_v44 }
 0x194   :  { %2088 = vmatprep.subr.bf16.mxu0 %v2513_v45 }
 0x249   :  { %v1253_v51 = vpop.f32.mrb[4].mxu0  ;;  %v1335_v53 = vpop.f32.mrb[4].mxu1 }
 0x24a   :  { %v2108_v55 = vadd.f32 %v1253_v51, %v521_v47  ;;  %v2110_v56 = vadd.f32 %v1335_v53, %v529_v48  ;;  %v1255_v57 = vpop.f32.mrb[5].mxu0  ;;  %v1337_v58 = vpop.f32.mrb[5].mxu1 }
 0x24b   :  { %v2109_v59 = vadd.f32 %v1255_v57, %v525_v49  ;;  %v2111_v60 = vadd.f32 %v1337_v58, %v533_v50  ;;  %v1257_v61 = vpop.f32.mrb[6].mxu0  ;;  %v1339_v62 = vpop.f32.mrb[6].mxu1 }
 0x24c   :  { %vm1342_vm4 = vcmp.gt.f32.partialorder %v2108_v55, 0.0  ;;  %v1346_v38 = vmul.f32 0.2, %v2108_v55  ;;  %vm1344_vm5 = vcmp.gt.f32.partialorder %v2110_v56, 0.0  ;;  %v1348_v54 = vmul.f32 0.2, %v2110_v56 }
 0x24d   :  { %vm1343_vm6 = vcmp.gt.f32.partialorder %v2109_v59, 0.0  ;;  %v1347_v0 = vmul.f32 0.2, %v2109_v59  ;;  %vm1345_vm7 = vcmp.gt.f32.partialorder %v2111_v60, 0.0  ;;  %v1349_v40 = vmul.f32 0.2, %v2111_v60 }
 0x24e   :  { %v1350_v37 = vsel %vm1342_vm4, %v2108_v55, %v1346_v38  ;;  %v1352_v52 = vsel %vm1344_vm5, %v2110_v56, %v1348_v54  ;;  %v1258_v1 = vpop.f32.mrb[7].mxu0  ;;  %v1340_v2 = vpop.f32.mrb[7].mxu1 }
 0x24f   :  { %v1351_v3 = vsel %vm1343_vm6, %v2109_v59, %v1347_v0  ;;  %v1353_v4 = vsel %vm1345_vm7, %v2111_v60, %v1349_v40  ;;  %v1354_v7 = vpack.c.bf16 %v1350_v37, %v1350_v37  ;;  %v1356_v8 = vpack.c.bf16 %v1352_v52, %v1352_v52 }
 0x250   :  { %v1355_v5 = vpack.c.bf16 %v1351_v3, %v1351_v3  ;;  %v1357_v6 = vpack.c.bf16 %v1353_v4, %v1353_v4 }
 0x252   :  { %1653 = vmatprep.mubr.bf16.mxu0 %v1355_v5  ;;  %1693 = vmatprep.mubr.bf16.mxu1 %v1357_v6 }
 0x253   :  { %1654 = vmatmul.mubr.bf16.vlgmr.msra.gmra.mrb[8].mxu0 %v1354_v7  ;;  %1694 = vmatmul.mubr.bf16.vlgmr.msra.gmra.mrb[8].mxu1 %v1356_v8 }
 0x254   :  { %2089 = vmatpush3.bf16.msra.mxu0 %v2403_v39  ;;  %2104 = vmatprep.mubr.msk.bf16.mxu0 %vm2514_vm8, %v2513_v45 }
 0x255   :  { %2090 = vmatprep.subr.bf16.mxu0 %v2513_v45 }
 0x258   :  { %2091 = vmatpush3.bf16.msra.mxu0 %v2404_v9 }
 0x259   :  { %2092 = vmatprep.subr.bf16.mxu0 %v2513_v45 }
 0x25c   :  { %2093 = vmatpush3.bf16.msra.mxu0 %v2405_v10 }
 0x25d   :  { %2094 = vmatprep.subr.bf16.mxu0 %v2513_v45 }
 0x260   :  { %2095 = vmatpush3.bf16.msra.mxu0 %v2406_v63 }
 0x261   :  { %2096 = vmatprep.subr.bf16.mxu0 %v2513_v45 }
 0x264   :  { %2097 = vmatpush3.bf16.msra.mxu0 %v2407_v11 }
 0x265   :  { %2098 = vmatprep.subr.bf16.mxu0 %v2513_v45 }
 0x268   :  { %2099 = vmatpush3.bf16.msra.mxu0 %v2408_v12 }
 0x269   :  { %2100 = vmatprep.subr.bf16.mxu0 %v2513_v45 }
 0x26c   :  { %2101 = vmatpush3.bf16.msra.mxu0 %v2409_v13 }
 0x26d   :  { %2102 = vmatprep.subr.bf16.mxu0 %v2513_v45 }
 0x270   :  { %2103 = vmatpush3.bf16.msra.mxu0 %v2410_v14 }
 0x326   :  { %v2051_v15 = vpop.f32.mrb[8].mxu0  ;;  %v2073_v16 = vpop.f32.mrb[8].mxu1 }
 0x327   :  { %v2052_v18 = vpop.f32.mrb[9].mxu0  ;;  %v2074_v19 = vpop.f32.mrb[9].mxu1 }
 0x328   :  { %v2053_v20 = vadd.f32 %v2052_v18, %v2051_v15  ;;  %v2075_v21 = vadd.f32 %v2074_v19, %v2073_v16  ;;  %v2054_v22 = vpop.f32.mrb[10].mxu0  ;;  %v2076_v23 = vpop.f32.mrb[10].mxu1 }
 0x329   :  { %v2055_v24 = vpop.f32.mrb[11].mxu0  ;;  %v2077_v25 = vpop.f32.mrb[11].mxu1 }
 0x32a   :  { %v1656_v26 = vadd.f32 %v2053_v20, %v1993_v17 }
 0x32c   :  { %v1696_v27 = vadd.f32 %v2075_v21, %v1656_v26 }
 0x32e   :  { %vm1701_vm9 = vcmp.gt.f32.partialorder %v1696_v27, 0.0  ;;  %v1702_v28 = vmul.f32 0.2, %v1696_v27 }
 0x330   :  { %v1703_v29 = vsel %vm1701_vm9, %v1696_v27, %v1702_v28 }
 0x331   :  { %v1704_v30 = vpack.c.bf16 %v1703_v29, %v1703_v29 }
 0x333   :  { %2105 = vmatmul.mubr.bf16.vlgmr.msra.gmra.mrb[12].mxu0 %v1704_v30 }
 0x406   :  { %v1810_v32 = vpop.f32.mrb[12].mxu0 }
 0x407   :  { %v1811_v33 = vadd.f32 %v2026_v31, %v1810_v32  ;;  %v2106_v34 = vpop.f32.mrb[13].mxu0 }
 0x408   :  { %v1813_v35 = vpop.f32.mrb[14].mxu0 }
 0x409   :  { %1816 = vst [vmem:[#allocation8] sm:$0x3] %v1811_v33  ;;  %v2107_v36 = vpop.f32.mrb[15].mxu0 }
 0x40a   :  { %2488 = shalt.err (!%p2485_p0)
}
 0x40b   :  { %s2489_s8 = scalar_lea.hbm %s2709_s9, 32 }
 0x40c   :  { %p2490_p1 = scmp.ne.s32.totalorder %s2709_s9, %s2489_s8  ;;  %p2493_p2 = scmp.lt.u32.totalorder %s2489_s8, %s2709_s9 }
 0x40e   :  { %p2495_p3 = pnand %p2493_p2, %p2490_p1 }
 0x410   :  { %2498 = shalt.err (!%p2495_p3)
}
 0x411   :  { %1826 = dma.vmem_to_hbm [thread:$0]  %s1824_s21, 32, %s2709_s9, [#allocation4]  }
 0x412   :  { %2503 = dma.done.wait [#allocation4], 32  }
 0x413   :  { %2504 = vsyncadd [#allocation4], 4294967264 }
 0x414   :  { %1830 = vsyncpa [#allocation3], 1 }
 0x415   :  { %1831 = vsyncpa [#allocation6], 1 }
 0x416   :  { %1832 = vsyncpa [#allocation4], 1 }

</bundles_post_ra>
